<compile_context>
chip_gen: v7x
topology: tpu7x:2x2x1
jax: 0.10.0
libtpu: 0.0.40
codegen_flags: <defaults>
</compile_context>

<pallas_src>
import functools

import jax
import jax.numpy as jnp
from jax.experimental import pallas as pl
from jax.experimental.pallas import tpu as pltpu


def _round_up(x, m):
    return ((x + m - 1) // m) * m


def _tpu_vmem_capacity_bytes():
    try:
        return int(pltpu.get_tpu_info().vmem_capacity_bytes)
    except Exception:
        return 64 * 1024 * 1024          # conservative (v7x per-core VMEM)


def _hydra_kernel(x_ref, wqkv_ref, bqkv_ref, o_ref, kv8_acc, kv1, q_scr, *,
                  head_size, seq_len, tile_s, n_s, needs_mask):
    """Phase 0: fused q/k/v projection, normalize, accumulate kv, stash q_hat.
    Phase 1: out = q_hat * kv (pure elementwise, no x DMA, no MXU)."""
    phase = pl.program_id(1)
    s_idx = pl.program_id(2)
    A = head_size
    eps = jnp.float32(1e-12)

    @pl.when(phase == 0)
    def _project_and_accumulate():
        @pl.when(s_idx == 0)
        def _init():
            kv8_acc[...] = jnp.zeros_like(kv8_acc)

        x = x_ref[0]                                        # (tile_s, H) bf16
        # Fused Q/K/V projection: one MXU push of output width 3*A, f32 acc.
        proj = jnp.dot(x, wqkv_ref[...], preferred_element_type=jnp.float32)
        proj = proj + bqkv_ref[...]                         # f32 bias add (VPU)
        q = proj[:, :A]
        k = proj[:, A:2 * A]
        v = proj[:, 2 * A:]
        # L2-normalize along features; rsqrt lands in the EUP slot, math in f32.
        q = q * jax.lax.rsqrt(jnp.sum(q * q, axis=-1, keepdims=True) + eps)
        k = k * jax.lax.rsqrt(jnp.sum(k * k, axis=-1, keepdims=True) + eps)
        kv = k * v                                          # (tile_s, A) f32

        def _accumulate(kv_tile):
            # Sum 8-row groups with plain vreg adds (no cross-sublane XLU);
            # the final 8 -> 1 collapse happens once per batch below.
            kv8_acc[...] += kv_tile.reshape(tile_s // 8, 8, A).sum(axis=0)

        if needs_mask:
            # Only the final S-tile holds padded rows; interior tiles skip the
            # iota/where entirely.
            @pl.when(s_idx < n_s - 1)
            def _full_tile():
                _accumulate(kv)

            @pl.when(s_idx == n_s - 1)
            def _tail_tile():
                row = jax.lax.broadcasted_iota(jnp.int32, (tile_s, 1), 0)
                valid = (row + s_idx * tile_s) < seq_len
                _accumulate(jnp.where(valid, kv, 0.0))
        else:
            _accumulate(kv)

        # Stash normalized q so phase 1 needs no second x pass.
        start = pl.multiple_of(s_idx * tile_s, tile_s)
        q_scr[pl.ds(start, tile_s), :] = q.astype(q_scr.dtype)

        @pl.when(s_idx == n_s - 1)
        def _collapse():
            # One cross-sublane XLU reduce per batch.
            kv1[...] = jnp.sum(kv8_acc[...], axis=0, keepdims=True)   # (1, A)

    @pl.when(phase == 1)
    def _apply():
        start = pl.multiple_of(s_idx * tile_s, tile_s)
        q_hat = q_scr[pl.ds(start, tile_s), :].astype(jnp.float32)
        o_ref[0] = (q_hat * kv1[...]).astype(o_ref.dtype)


def hydra_attention(x, wq, wk, wv, bq, bk, bv, *, tile_s=None,
                    compute_dtype=jnp.bfloat16):
    B, S, H = x.shape
    A = wq.shape[1]

    vmem_cap = _tpu_vmem_capacity_bytes()

    # ---- sequence tiling (dtype-aware sublane rounding) --------------------
    itemsize = jnp.dtype(compute_dtype).itemsize
    sub_mult = max(8, 32 // itemsize)         # f32: 8, bf16: 16, int8/fp8: 32
    if tile_s is None:
        # Bigger tiles on 128 MiB-VMEM parts (v5e/v6e); keep 512 on v7x.
        tile_s = 1024 if vmem_cap >= (96 << 20) else 512
        tile_s = max(tile_s, 256)             # fill the MXU M dimension
    tile_s = min(_round_up(tile_s, sub_mult), _round_up(S, sub_mult))
    s_pad = _round_up(S, tile_s)
    n_s = s_pad // tile_s
    needs_mask = (s_pad != S)
    if needs_mask:
        x = jnp.pad(x, ((0, 0), (0, s_pad - S), (0, 0)))

    # ---- bf16 operands for the MXU; f32 biases added post-matmul -----------
    x_c = x.astype(compute_dtype)
    wqkv = jnp.concatenate([wq, wk, wv], axis=1).astype(compute_dtype)  # (H,3A)
    bqkv = jnp.concatenate([bq, bk, bv]).reshape(1, 3 * A).astype(jnp.float32)

    # ---- generation-aware VMEM budget ---------------------------------------
    # v7x: 64 MiB physical -> ~40 MiB scoped; v5e/v6e: 128 MiB -> 100 MiB.
    vmem_limit = (100 << 20) if vmem_cap >= (96 << 20) else (40 << 20)

    kernel = functools.partial(
        _hydra_kernel, head_size=A, seq_len=S, tile_s=tile_s, n_s=n_s,
        needs_mask=needs_mask)

    # NOTE: the output index_map parks on block (b, 0) during phase 0, so no
    # uninitialized VMEM is ever flushed: phase-1 s=0 fully overwrites the
    # parked block before its index changes (writeback-on-index-change).
    # TODO(synk): on v7x with very large H*A, single-buffer the weight specs
    # (pipeline_mode=pl.Buffered(1)) and/or add an A-block grid axis so the
    # weights do not occupy 2x their size in the 64 MiB VMEM.
    # TODO(synk): for very long sequences (s_pad*A*2B beyond ~1/3 of VMEM) fall
    # back to re-projecting q in phase 1 instead of staging q_hat in VMEM.
    out = pl.pallas_call(
        kernel,
        out_shape=jax.ShapeDtypeStruct((B, s_pad, A), x.dtype),
        grid_spec=pltpu.PrefetchScalarGridSpec(
            num_scalar_prefetch=0,
            grid=(B, 2, n_s),                       # (batch, phase, S-tile)
            in_specs=[
                # x: streamed in phase 0; parked on its last block during
                # phase 1 so no DMA is issued for the second phase.
                pl.BlockSpec(
                    (1, tile_s, H),
                    lambda b, p, s: (b, s * (1 - p) + (n_s - 1) * p, 0)),
                pl.BlockSpec((H, 3 * A), lambda b, p, s: (0, 0)),    # Wqkv
                pl.BlockSpec((1, 3 * A), lambda b, p, s: (0, 0)),    # bqkv
            ],
            out_specs=pl.BlockSpec((1, tile_s, A),
                                   lambda b, p, s: (b, s * p, 0)),
            scratch_shapes=[
                pltpu.VMEM((8, A), jnp.float32),         # kv accumulator (VPU)
                pltpu.VMEM((1, A), jnp.float32),         # collapsed kv
                pltpu.VMEM((s_pad, A), compute_dtype),   # staged normalized q
            ],
        ),
        compiler_params=pltpu.CompilerParams(
            dimension_semantics=("parallel", "arbitrary", "arbitrary"),
            vmem_limit_bytes=vmem_limit,
        ),
    )(x_c, wqkv, bqkv)

    return out[:, :S, :] if needs_mask else out


def hydra_reference(x, wq, wk, wv, bq, bk, bv):
    q = x @ wq + bq
    k = x @ wk + bk
    v = x @ wv + bv
    q = q / jnp.linalg.norm(q, axis=-1, keepdims=True)
    k = k / jnp.linalg.norm(k, axis=-1, keepdims=True)
    kv = jnp.sum(k * v, axis=-2, keepdims=True)
    return q * kv


if __name__ == "__main__":
    key = jax.random.PRNGKey(0)
    kx, kq, kk, kv_, kbq, kbk, kbv, kx2 = jax.random.split(key, 8)

    B, S, H, A = 2, 8, 32, 32   # hidden_size=32, all_head_size=32

    x = jax.random.normal(kx, (B, S, H), dtype=jnp.float32)
    scale = 1.0 / jnp.sqrt(jnp.float32(H))
    wq = jax.random.uniform(kq, (H, A), jnp.float32, -scale, scale)
    wk = jax.random.uniform(kk, (H, A), jnp.float32, -scale, scale)
    wv = jax.random.uniform(kv_, (H, A), jnp.float32, -scale, scale)
    bq = jax.random.uniform(kbq, (A,), jnp.float32, -scale, scale)
    bk = jax.random.uniform(kbk, (A,), jnp.float32, -scale, scale)
    bv = jax.random.uniform(kbv, (A,), jnp.float32, -scale, scale)

    # bf16-quantized-input reference isolates MXU-dtype rounding from kernel
    # structure; the kernel should match it tightly.  The f32 reference check
    # bounds the total bf16 error at a loose tolerance.
    dq = lambda a: a.astype(jnp.bfloat16).astype(jnp.float32)

    out = jax.block_until_ready(hydra_attention(x, wq, wk, wv, bq, bk, bv))
    ref_q = hydra_reference(dq(x), dq(wq), dq(wk), dq(wv), bq, bk, bv)
    ref_f = hydra_reference(x, wq, wk, wv, bq, bk, bv)
    assert out.shape == (B, S, A)
    assert jnp.allclose(out, ref_q, atol=5e-3, rtol=5e-3), "mismatch (bf16-input ref)"
    assert jnp.allclose(out, ref_f, atol=5e-2, rtol=5e-2), "mismatch (f32 ref)"

    # Ragged-S path: multi-tile kv accumulation + padded-tail mask
    # (S=20 padded to 32 with two 16-row tiles).
    S2 = 20
    x2 = jax.random.normal(kx2, (B, S2, H), dtype=jnp.float32)
    out2 = jax.block_until_ready(
        hydra_attention(x2, wq, wk, wv, bq, bk, bv, tile_s=16))
    ref2_q = hydra_reference(dq(x2), dq(wq), dq(wk), dq(wv), bq, bk, bv)
    ref2_f = hydra_reference(x2, wq, wk, wv, bq, bk, bv)
    assert out2.shape == (B, S2, A)
    assert jnp.allclose(out2, ref2_q, atol=5e-3, rtol=5e-3), "mismatch (ragged, bf16 ref)"
    assert jnp.allclose(out2, ref2_f, atol=5e-2, rtol=5e-2), "mismatch (ragged, f32 ref)"

    print("KERNEL_OK")
</pallas_src>

<mosaic_0001>
module attributes {stable_mosaic.version = 11 : i64} {
  func.func @_hydra_kernel(%arg0: i32, %arg1: i32, %arg2: i32, %arg3: memref<1x16x32xbf16, #tpu.memory_space<vmem>>, %arg4: memref<32x96xbf16, #tpu.memory_space<vmem>>, %arg5: memref<1x96xf32, #tpu.memory_space<vmem>>, %arg6: memref<1x16x32xf32, #tpu.memory_space<vmem>>, %arg7: memref<8x32xf32, #tpu.memory_space<vmem>>, %arg8: memref<1x32xf32, #tpu.memory_space<vmem>>, %arg9: memref<16x32xbf16, #tpu.memory_space<vmem>>) attributes {dimension_semantics = [#tpu.dimension_semantics<parallel>, #tpu.dimension_semantics<arbitrary>, #tpu.dimension_semantics<arbitrary>], iteration_bounds = array<i64: 2, 2, 1>, scalar_prefetch = 0 : i64, scratch_operands = 3 : i64, tpu.core_type = #tpu.core_type<tc>, window_params = [{transform_indices = @transform_0, window_bounds = array<i64: 1, 16, 32>}, {pipeline_mode = #tpu.pipeline_mode<synchronous>, transform_indices = @transform_1, window_bounds = array<i64: 32, 96>}, {pipeline_mode = #tpu.pipeline_mode<synchronous>, transform_indices = @transform_2, window_bounds = array<i64: 1, 96>}, {transform_indices = @transform_3, window_bounds = array<i64: 1, 16, 32>}]} {
    %c0_i32 = arith.constant 0 : i32
    %0 = arith.cmpi eq, %arg1, %c0_i32 : i32
    %1 = arith.extui %0 : i1 to i32
    %cst = arith.constant 9.99999996E-13 : f32
    %c0_i32_0 = arith.constant 0 : i32
    %2 = arith.cmpi ne, %1, %c0_i32_0 : i32
    scf.if %2 {
      %c0_i32_2 = arith.constant 0 : i32
      %6 = arith.cmpi eq, %arg2, %c0_i32_2 : i32
      %7 = arith.extui %6 : i1 to i32
      %c0_i32_3 = arith.constant 0 : i32
      %8 = arith.cmpi ne, %7, %c0_i32_3 : i32
      scf.if %8 {
        %cst_20 = arith.constant 0.000000e+00 : f32
        %50 = vector.broadcast %cst_20 : f32 to vector<8x32xf32>
        %c0_21 = arith.constant 0 : index
        %c0_22 = arith.constant 0 : index
        %51 = vector.load %arg7[%c0_21, %c0_22] : memref<8x32xf32, #tpu.memory_space<vmem>>, vector<8x32xf32>
        tpu.vector_store %arg7[%c0_21, %c0_22], %50 {strides = array<i32>} : memref<8x32xf32, #tpu.memory_space<vmem>>, vector<8x32xf32>,
      } else {
      }
      %c0 = arith.constant 0 : index
      %c0_4 = arith.constant 0 : index
      %c0_5 = arith.constant 0 : index
      %9 = vector.load %arg3[%c0, %c0_4, %c0_5] : memref<1x16x32xbf16, #tpu.memory_space<vmem>>, vector<1x16x32xbf16>
      %10 = vector.shape_cast %9 : vector<1x16x32xbf16> to vector<16x32xbf16>
      %c0_6 = arith.constant 0 : index
      %c0_7 = arith.constant 0 : index
      %11 = vector.load %arg4[%c0_6, %c0_7] : memref<32x96xbf16, #tpu.memory_space<vmem>>, vector<32x96xbf16>
      %cst_8 = arith.constant dense<0.000000e+00> : vector<16x96xf32>
      %12 = tpu.matmul %10, %11, %cst_8 {dimension_numbers = #tpu.dot_dimension_numbers<[1], [0], [0], [1], [0, 0, 1, 1], [], []>} : vector<16x32xbf16>, vector<32x96xbf16>, vector<16x96xf32> -> vector<16x96xf32>
      %c0_9 = arith.constant 0 : index
      %c0_10 = arith.constant 0 : index
      %13 = vector.load %arg5[%c0_9, %c0_10] : memref<1x96xf32, #tpu.memory_space<vmem>>, vector<1x96xf32>
      %14 = vector.broadcast %13 : vector<1x96xf32> to vector<16x96xf32>
      %15 = arith.addf %12, %14 : vector<16x96xf32>
      %16 = vector.extract_strided_slice %15 {offsets = [0, 0], sizes = [16, 32], strides = [1, 1]} : vector<16x96xf32> to vector<16x32xf32>
      %17 = vector.extract_strided_slice %15 {offsets = [0, 32], sizes = [16, 32], strides = [1, 1]} : vector<16x96xf32> to vector<16x32xf32>
      %18 = vector.extract_strided_slice %15 {offsets = [0, 64], sizes = [16, 32], strides = [1, 1]} : vector<16x96xf32> to vector<16x32xf32>
      %19 = arith.mulf %16, %16 : vector<16x32xf32>
      %cst_11 = arith.constant dense<0.000000e+00> : vector<16xf32>
      %20 = vector.multi_reduction <add>, %19, %cst_11 [1] : vector<16x32xf32> to vector<16xf32>
      %21 = vector.shape_cast %20 : vector<16xf32> to vector<16x1xf32>
      %22 = vector.broadcast %cst : f32 to vector<16x1xf32>
      %23 = arith.addf %21, %22 : vector<16x1xf32>
      %24 = math.rsqrt %23 : vector<16x1xf32>
      %25 = vector.broadcast %24 : vector<16x1xf32> to vector<16x32xf32>
      %26 = arith.mulf %16, %25 : vector<16x32xf32>
      %27 = arith.mulf %17, %17 : vector<16x32xf32>
      %cst_12 = arith.constant dense<0.000000e+00> : vector<16xf32>
      %28 = vector.multi_reduction <add>, %27, %cst_12 [1] : vector<16x32xf32> to vector<16xf32>
      %29 = vector.shape_cast %28 : vector<16xf32> to vector<16x1xf32>
      %30 = vector.broadcast %cst : f32 to vector<16x1xf32>
      %31 = arith.addf %29, %30 : vector<16x1xf32>
      %32 = math.rsqrt %31 : vector<16x1xf32>
      %33 = vector.broadcast %32 : vector<16x1xf32> to vector<16x32xf32>
      %34 = arith.mulf %17, %33 : vector<16x32xf32>
      %35 = arith.mulf %34, %18 : vector<16x32xf32>
      %c0_i32_13 = arith.constant 0 : i32
      %36 = arith.cmpi slt, %arg2, %c0_i32_13 : i32
      %37 = arith.extui %36 : i1 to i32
      %c0_i32_14 = arith.constant 0 : i32
      %38 = arith.cmpi ne, %37, %c0_i32_14 : i32
      scf.if %38 {
        %c0_20 = arith.constant 0 : index
        %c0_21 = arith.constant 0 : index
        %50 = vector.load %arg7[%c0_20, %c0_21] : memref<8x32xf32, #tpu.memory_space<vmem>>, vector<8x32xf32>
        %51 = vector.shape_cast %35 : vector<16x32xf32> to vector<2x8x32xf32>
        %cst_22 = arith.constant dense<0.000000e+00> : vector<8x32xf32>
        %52 = vector.multi_reduction <add>, %51, %cst_22 [0] : vector<2x8x32xf32> to vector<8x32xf32>
        %53 = arith.addf %50, %52 : vector<8x32xf32>
        %c0_23 = arith.constant 0 : index
        %c0_24 = arith.constant 0 : index
        %54 = vector.load %arg7[%c0_23, %c0_24] : memref<8x32xf32, #tpu.memory_space<vmem>>, vector<8x32xf32>
        tpu.vector_store %arg7[%c0_23, %c0_24], %53 {strides = array<i32>} : memref<8x32xf32, #tpu.memory_space<vmem>>, vector<8x32xf32>,
      } else {
      }
      %c0_i32_15 = arith.constant 0 : i32
      %39 = arith.cmpi eq, %arg2, %c0_i32_15 : i32
      %40 = arith.extui %39 : i1 to i32
      %c0_i32_16 = arith.constant 0 : i32
      %41 = arith.cmpi ne, %40, %c0_i32_16 : i32
      scf.if %41 {
        %50 = tpu.iota {dimensions = array<i32: 0>} : vector<16x1xi32>
        %c16_i32_20 = arith.constant 16 : i32
        %51 = arith.muli %arg2, %c16_i32_20 : i32
        %52 = vector.broadcast %51 : i32 to vector<16x1xi32>
        %53 = arith.addi %50, %52 : vector<16x1xi32>
        %c8_i32 = arith.constant 8 : i32
        %54 = vector.broadcast %c8_i32 : i32 to vector<16x1xi32>
        %55 = arith.cmpi slt, %53, %54 : vector<16x1xi32>
        %cst_21 = arith.constant 0.000000e+00 : f32
        %56 = vector.shape_cast %55 : vector<16x1xi1> to vector<16x1xi1>
        %57 = vector.broadcast %56 : vector<16x1xi1> to vector<16x32xi1>
        %58 = vector.broadcast %cst_21 : f32 to vector<16x32xf32>
        %59 = arith.select %57, %35, %58 : vector<16x32xi1>, vector<16x32xf32>
        %c0_22 = arith.constant 0 : index
        %c0_23 = arith.constant 0 : index
        %60 = vector.load %arg7[%c0_22, %c0_23] : memref<8x32xf32, #tpu.memory_space<vmem>>, vector<8x32xf32>
        %61 = vector.shape_cast %59 : vector<16x32xf32> to vector<2x8x32xf32>
        %cst_24 = arith.constant dense<0.000000e+00> : vector<8x32xf32>
        %62 = vector.multi_reduction <add>, %61, %cst_24 [0] : vector<2x8x32xf32> to vector<8x32xf32>
        %63 = arith.addf %60, %62 : vector<8x32xf32>
        %c0_25 = arith.constant 0 : index
        %c0_26 = arith.constant 0 : index
        %64 = vector.load %arg7[%c0_25, %c0_26] : memref<8x32xf32, #tpu.memory_space<vmem>>, vector<8x32xf32>
        tpu.vector_store %arg7[%c0_25, %c0_26], %63 {strides = array<i32>} : memref<8x32xf32, #tpu.memory_space<vmem>>, vector<8x32xf32>,
      } else {
      }
      %c16_i32 = arith.constant 16 : i32
      %42 = arith.muli %arg2, %c16_i32 : i32
      %43 = tpu.assume_multiple %42, 16 : i32
      %44 = arith.truncf %26 : vector<16x32xf32> to vector<16x32xbf16>
      %45 = arith.index_cast %43 : i32 to index
      %c0_17 = arith.constant 0 : index
      %46 = vector.load %arg9[%45, %c0_17] : memref<16x32xbf16, #tpu.memory_space<vmem>>, vector<16x32xbf16>
      tpu.vector_store %arg9[%45, %c0_17], %44 {strides = array<i32>} : memref<16x32xbf16, #tpu.memory_space<vmem>>, vector<16x32xbf16>,
      %c0_i32_18 = arith.constant 0 : i32
      %47 = arith.cmpi eq, %arg2, %c0_i32_18 : i32
      %48 = arith.extui %47 : i1 to i32
      %c0_i32_19 = arith.constant 0 : i32
      %49 = arith.cmpi ne, %48, %c0_i32_19 : i32
      scf.if %49 {
        %c0_20 = arith.constant 0 : index
        %c0_21 = arith.constant 0 : index
        %50 = vector.load %arg7[%c0_20, %c0_21] : memref<8x32xf32, #tpu.memory_space<vmem>>, vector<8x32xf32>
        %cst_22 = arith.constant dense<0.000000e+00> : vector<32xf32>
        %51 = vector.multi_reduction <add>, %50, %cst_22 [0] : vector<8x32xf32> to vector<32xf32>
        %52 = vector.shape_cast %51 : vector<32xf32> to vector<1x32xf32>
        %c0_23 = arith.constant 0 : index
        %c0_24 = arith.constant 0 : index
        %53 = vector.load %arg8[%c0_23, %c0_24] : memref<1x32xf32, #tpu.memory_space<vmem>>, vector<1x32xf32>
        tpu.vector_store %arg8[%c0_23, %c0_24], %52 {strides = array<i32>} : memref<1x32xf32, #tpu.memory_space<vmem>>, vector<1x32xf32>,
      } else {
      }
    } else {
    }
    %c1_i32 = arith.constant 1 : i32
    %3 = arith.cmpi eq, %arg1, %c1_i32 : i32
    %4 = arith.extui %3 : i1 to i32
    %c0_i32_1 = arith.constant 0 : i32
    %5 = arith.cmpi ne, %4, %c0_i32_1 : i32
    scf.if %5 {
      %c16_i32 = arith.constant 16 : i32
      %6 = arith.muli %arg2, %c16_i32 : i32
      %7 = tpu.assume_multiple %6, 16 : i32
      %8 = arith.index_cast %7 : i32 to index
      %c0 = arith.constant 0 : index
      %9 = vector.load %arg9[%8, %c0] : memref<16x32xbf16, #tpu.memory_space<vmem>>, vector<16x32xbf16>
      %10 = arith.extf %9 : vector<16x32xbf16> to vector<16x32xf32>
      %c0_2 = arith.constant 0 : index
      %c0_3 = arith.constant 0 : index
      %11 = vector.load %arg8[%c0_2, %c0_3] : memref<1x32xf32, #tpu.memory_space<vmem>>, vector<1x32xf32>
      %12 = vector.broadcast %11 : vector<1x32xf32> to vector<16x32xf32>
      %13 = arith.mulf %10, %12 : vector<16x32xf32>
      %c0_4 = arith.constant 0 : index
      %c0_5 = arith.constant 0 : index
      %c0_6 = arith.constant 0 : index
      %14 = vector.load %arg6[%c0_4, %c0_5, %c0_6] : memref<1x16x32xf32, #tpu.memory_space<vmem>>, vector<1x16x32xf32>
      %15 = vector.shape_cast %14 : vector<1x16x32xf32> to vector<16x32xf32>
      %16 = vector.shape_cast %13 : vector<16x32xf32> to vector<1x16x32xf32>
      tpu.vector_store %arg6[%c0_4, %c0_5, %c0_6], %16 {strides = array<i32>} : memref<1x16x32xf32, #tpu.memory_space<vmem>>, vector<1x16x32xf32>,
    } else {
    }
    return
  }
  func.func @transform_0(%arg0: i32, %arg1: i32, %arg2: i32) -> (i32, i32, i32) {
    %c1_i32 = arith.constant 1 : i32
    %0 = arith.subi %c1_i32, %arg1 : i32
    %1 = arith.muli %arg2, %0 : i32
    %c0_i32 = arith.constant 0 : i32
    %2 = arith.muli %c0_i32, %arg1 : i32
    %3 = arith.addi %1, %2 : i32
    %c0_i32_0 = arith.constant 0 : i32
    %c0_i32_1 = arith.constant 0 : i32
    return %arg0, %3, %c0_i32_0 : i32, i32, i32
  }
  func.func @transform_1(%arg0: i32, %arg1: i32, %arg2: i32) -> (i32, i32) {
    %c0_i32 = arith.constant 0 : i32
    %c0_i32_0 = arith.constant 0 : i32
    %c0_i32_1 = arith.constant 0 : i32
    return %c0_i32, %c0_i32_0 : i32, i32
  }
  func.func @transform_2(%arg0: i32, %arg1: i32, %arg2: i32) -> (i32, i32) {
    %c0_i32 = arith.constant 0 : i32
    %c0_i32_0 = arith.constant 0 : i32
    %c0_i32_1 = arith.constant 0 : i32
    return %c0_i32, %c0_i32_0 : i32, i32
  }
  func.func @transform_3(%arg0: i32, %arg1: i32, %arg2: i32) -> (i32, i32, i32) {
    %0 = arith.muli %arg2, %arg1 : i32
    %c0_i32 = arith.constant 0 : i32
    %c0_i32_0 = arith.constant 0 : i32
    return %arg0, %0, %c0_i32 : i32, i32, i32
  }
}

</mosaic_0001>

<bundles_post_ra>
// kernel: tpu_custom_call.1
= control target key start
LH: loop header
LB: loop body
LE: loop exit
PB: predicated region body
PF: predicated region fallthrough
CT: control target
= control target key end

     0   :  { %8 = vsyncpa [#allocation6], 0  ;;  %s1180_s0 = inlined_call_operand.hbm [shape: bf16[2,16,32], index: 0, kind: input, shape index: {}]   ;;  %s1181_s1 = inlined_call_operand.hbm [shape: bf16[32,96], index: 1, kind: input, shape index: {}]   ;;  %s1182_s2 = inlined_call_operand.vmem [shape: f32[1,96], index: 2, kind: input, shape index: {}]   ;;  %s1183_s3 = inlined_call_operand.hbm [shape: f32[2,16,32], index: 3, kind: output, shape index: {}]  }
   0x1   :  { %10 = vsyncpa [#allocation6 + $0x1], 0 }
   0x2   :  { %11 = vsyncpa [#allocation9], 0 }
   0x3   :  { %12 = vsyncpa [#allocation7], 0 }
   0x4   :  { %14 = vsyncpa [#allocation7 + $0x1], 0  ;;  %s919_s12 = smov 0   ;;  %s921_s13 = smov 0  }
   0x5   :  { %s923_s14 = smov 0   ;;  %s925_s15 = smov 0  }
   0x6   :  { %s927_s16 = smov 0   ;;  %s929_s17 = smov 0  }
   0x7   :  { %s931_s18 = smov 0   ;;  %s933_s19 = smov 0  }
   0x8 LB: > { %s584_s20 = sadd.s32 4294967295, %s887_s19   ;;  %s585_s21 = sadd.s32 4294967294, %s887_s19   ;;  %s887_s19 = sphi %s933_s19, %s20_s19   ;;  %s883_s18 = sphi %s931_s18, %s1211_s18   ;;  %s879_s17 = sphi %s929_s17, %s1210_s17   ;;  %s875_s16 = sphi %s927_s16, %s1209_s16   ;;  %s871_s15 = sphi %s925_s15, %s1208_s15   ;;  %s867_s14 = sphi %s923_s14, %s1207_s14   ;;  %s863_s13 = sphi %s921_s13, %s1206_s13   ;;  %s859_s12 = sphi %s919_s12, %s1205_s12  }
   0x9   : > { %p65_p0 = scmp.ne.s32.totalorder %s863_s13, %s859_s12  ;;  %p963_p1 = scmp.eq.s32.totalorder %s584_s20, 0 }
   0xa   : > { %p967_p2 = scmp.eq.s32.totalorder %s584_s20, 3  ;;  %p141_p3 = scmp.eq.s32.totalorder %s585_s21, 3 }
   0xb   : > { %s1190_s22 = scalar_select %p963_p1, 1, 0 }
   0xc   : > { %s1191_s23 = scalar_select %p967_p2, 1, 0 }
   0xd   : > { %p973_p4 = por %p963_p1, %p65_p0  ;;  %p586_p5 = scmp.ge.s32.totalorder %s887_s19, 1 }
   0xe   : > { %p978_p6 = por %p141_p3, %p65_p0  ;;  %p148_p7 = scmp.lt.s32.totalorder %s887_s19, 5 }
   0xf   : > { %s1192_s24 = scalar_select %p973_p4, 1, 0 }
  0x10   : > { %s1193_s25 = scalar_select %p978_p6, 1, 0 }
  0x11   : > { %p983_p8 = pnand %p586_p5, %p148_p7  ;;  %s889_s27 = smov [#allocation8]  }
  0x12   : > { %s160_s28 = sshll.u32 %s889_s27, 4  ;;  %s727_s5 = scalar_lea.hbm %s1181_s1, 256  ;;  %s161_s28 = int_to_ptr.vmem [resolvable:$true] %s160_s28 }
  0x13   : > { %s1194_s26 = scalar_select %p983_p8, 1, 0 }
  0x14   : > { %p630_p9 = pneg %p983_p8  ;;  %p728_p11 = scmp.ne.s32.totalorder %s1181_s1, %s727_s5 }
  0x15   : > { %p734_p3 = scmp.lt.u32.totalorder %s727_s5, %s1181_s1 }
  0x16   : > { %p991_p10 = pnand %p630_p9, %p963_p1 }
  0x18   : > { %p729_p12 = pneg %p991_p10 }
  0x1a   : > { %p730_p13 = pnand %p729_p12, %p728_p11 }
  0x1c   : > { %p731_p0 = pneg %p730_p13 }
  0x1e   : > { %p736_p5 = pnand %p734_p3, %p731_p0 }
  0x20   : > { %739 = shalt.err (!%p736_p5)
}
  0x21   : > { %s740_s10 = scalar_lea.vmem %s161_s28, 256  ;;  %p748_p1 = scmp.lt.s32.totalorder %s161_s28, %s161_s28 }
  0x22   : > { %p741_p7 = scmp.ne.s32.totalorder %s161_s28, %s740_s10  ;;  %p749_p4 = scmp.lt.s32.totalorder %s740_s10, %s740_s10 }
  0x24   : > { %p743_p9 = pnand %p741_p7, %p729_p12  ;;  %p750_p8 = por %p749_p4, %p748_p1 }
  0x26   : > { %p744_p6 = pneg %p743_p9 }
  0x28   : > { %p751_p2 = pnand %p750_p8, %p744_p6 }
  0x2a   : > { %754 = shalt.err (!%p751_p2)
}
  0x2b   : > { %s1188_s11 = smov 64   ;;  %s1189_s20 = smov 4  }
  0x2c   : > { %633 = dma.hbm_to_vmem [thread:$0]  (!%p991_p10), %s1181_s1, 256, %s161_s28, [#allocation9], %s1188_s11, %s1188_s11, %s1189_s20  }
  0x2d   : > { %s35_s30 = sadd.s32 1, %s879_s17  ;;  %s39_s4 = sadd.s32 1, %s883_s18 }
  0x2e   : > { %p37_p1 = scmp.ge.s32.totalorder %s35_s30, 2  ;;  %s52_s5 = sadd.s32 1, %s867_s14 }
  0x2f   : > { %p59_p2 = scmp.ne.s32.totalorder %s867_s14, %s863_s13  ;;  %p60_p4 = scmp.eq.s32.totalorder %s887_s19, 0 }
  0x30   : > { %s1213_s30 = smov (%p37_p1, %s35_s30), 0  ;;  %s1215_s4 = smov (!%p37_p1, %s39_s4), %s883_s18 }
  0x31   : > { %p1196_p6 = scmp.ne.s32.totalorder %s1191_s23, 0  ;;  %p41_p11 = scmp.ge.s32.totalorder %s1215_s4, 2 }
  0x32   : > { %p643_p10 = scmp.lt.s32.totalorder %s887_s19, 4  ;;  %p61_p12 = por %p60_p4, %p59_p2 }
  0x33   : > { %p1025_p8 = por %p1196_p6, %p59_p2  ;;  %s177_s28 = sand.u32 1, %s867_s14  }
  0x34   : > { %s1217_s4 = smov (%p41_p11, %s1215_s4), 0  ;;  %s589_s6 = sshll.u32 %s177_s28, 3 }
  0x35   : > { %s47_s7 = ssub.s32 %s883_s18, %s1217_s4  ;;  %s609_s8 = sshll.u32 %s883_s18, 7 }
  0x36   : > { %p50_p13 = scmp.eq.s32.totalorder %s47_s7, 0  ;;  %s1039_s23 = scalar_lea.hbm %s1180_s0, %s609_s8 }
  0x37   : > { %s181_s21 = scalar_lea.vmem [#allocation5], %s589_s6  ;;  %p1048_p0 = pnand %p643_p10, %p61_p12 }
  0x38   : > { %s192_s27 = sshll.u32 %s181_s21, 4  ;;  %s1052_s7 = scalar_lea.sflag [#allocation6], %s177_s28  ;;  %s1044_s27 = int_to_ptr.vmem [resolvable:$true] %s192_s27 }
  0x39   : > { %s1042_s11 = scalar_select %p50_p13, %s867_s14, %s52_s5  }
  0x3a   : > { %s755_s8 = scalar_lea.hbm %s1039_s23, 128  ;;  %p757_p5 = pneg %p1048_p0 }
  0x3b   : > { %p756_p3 = scmp.ne.s32.totalorder %s1039_s23, %s755_s8  ;;  %s760_s9 = scalar_lea.hbm %s1180_s0, 256 }
  0x3c   : > { %p761_p1 = scmp.lt.u32.totalorder %s1039_s23, %s1180_s0  ;;  %p762_p2 = scmp.lt.u32.totalorder %s760_s9, %s755_s8 }
  0x3d   : > { %p758_p7 = pnand %p757_p5, %p756_p3  ;;  %p764_p6 = scmp.lt.u32.totalorder %s755_s8, %s1039_s23 }
  0x3e   : > { %p763_p4 = por %p762_p2, %p761_p1 }
  0x3f   : > { %p759_p9 = pneg %p758_p7 }
  0x40   : > { %p765_p11 = por %p764_p6, %p763_p4 }
  0x42   : > { %p766_p10 = pnand %p765_p11, %p759_p9 }
  0x44   : > { %769 = shalt.err (!%p766_p10)
}
  0x45   : > { %s770_s28 = scalar_lea.vmem %s1044_s27, 128  ;;  %s892_s5 = smov [#allocation5]  }
  0x46   : > { %p771_p12 = scmp.ne.s32.totalorder %s1044_s27, %s770_s28  ;;  %s775_s6 = sshll.u32 %s892_s5, 4  ;;  %s776_s6 = int_to_ptr.vmem [resolvable:$false] %s775_s6 }
  0x47   : > { %s777_s10 = scalar_lea.vmem %s776_s6, 256  ;;  %p778_p7 = scmp.lt.s32.totalorder %s1044_s27, %s776_s6 }
  0x48   : > { %p773_p13 = pnand %p771_p12, %p757_p5  ;;  %p779_p1 = scmp.lt.s32.totalorder %s777_s10, %s770_s28 }
  0x4a   : > { %p774_p3 = pneg %p773_p13  ;;  %p780_p2 = por %p779_p1, %p778_p7 }
  0x4c   : > { %p781_p4 = pnand %p780_p2, %p774_p3 }
  0x4e   : > { %784 = shalt.err (!%p781_p4)
}
  0x4f   : > { %s1199_s8 = smov 4   ;;  %s1200_s9 = smov 64  }
  0x50   : > { %637 = dma.hbm_to_vmem [thread:$0]  (!%p1048_p0), %s1039_s23, 128, %s1044_s27, %s1052_s7, %s1200_s9, %s1200_s9, %s1199_s8  }
  0x51   : > { %p1201_p5 = scmp.ne.s32.totalorder %s1194_s26, 0 }
  0x52   : > { %s1086_s21 = sand.u32 (!%p1201_p5), 1, %s863_s13   ;;  %p1202_p9 = scmp.ne.s32.totalorder (!%p1201_p5), %s1192_s24, 0 }
  0x53   : > { %204 = sbr.rel (%p1201_p5) target bundleno = 770 (0x302), region = 32  ;;  %s593_s28 = sshll.u32 (!%p1201_p5), %s1086_s21, 3 }
  0x54   : > { %s207_s5 = scalar_lea.sflag (!%p1201_p5), [#allocation6], %s1086_s21  ;;  %s210_s6 = scalar_lea.vmem (!%p1201_p5), [#allocation5], %s593_s28 }
  0x5a   : > { %846 = dma.done.wait (%p1202_p9), %s207_s5, 128  }
  0x5b   : > { %848 = vsyncadd (%p1202_p9), %s207_s5, 4294967168  ;;  %p1203_p6 = scmp.ne.s32.totalorder %s1190_s22, 0 }
  0x5d   : > { %850 = dma.done.wait (%p1203_p6), [#allocation9], 256  }
  0x5e   : > { %852 = vsyncadd (%p1203_p6), [#allocation9], 4294967040  ;;  %s595_s26 = sshll.u32 %s1086_s21, 4  ;;  %p596_p0 = scmp.ne.s32.totalorder %s871_s15, 0 }
  0x5f   : > { %s1099_s20 = scalar_lea.vmem [#allocation10], %s595_s26  ;;  %vm251_vm0 = vcmask (!%p596_p0), 261120   ;;  %v893_v0 = vmov (!%p596_p0), 0.0   ;;  %v718_v1 = vld [vmem:[#allocation8] sm:$0xff] (!%p596_p0)   ;;  %vm894_vm1 = vmmov (!%p596_p0), 0   ;;  %v719_v2 = vld [vmem:[#allocation8 + $0x8] sm:$0xff] (!%p596_p0)  }
  0x60   : > { %246 = sbr.rel (%p596_p0) target bundleno = 735 (0x2df), region = 44  ;;  %252 = vst.msk [vmem:[#allocation2] sm:$0xff] (!%p596_p0), %vm251_vm0, %v893_v0  ;;  %614 = vmatprep.subr.bf16.mxu0 (!%p596_p0), %v893_v0  ;;  %618 = vmatprep.mubr.msk.bf16.mxu0 (!%p596_p0), %vm894_vm1, %v893_v0  ;;  %v720_v3 = vld [vmem:[%s210_s6] sm:$0xff] (!%p596_p0)   ;;  %s895_s23 = smov (!%p596_p0), 96   ;;  %vm406_vm2 = vcmask (!%p596_p0), 523520   ;;  %vm434_vm3 = vcmask (!%p596_p0), 253952  }
  0x61   : > { %615 = vmatpush3.bf16.msra.mxu0 (!%p596_p0), %v718_v1  ;;  %v597_v4 = vld [vmem:[%s1182_s2] ss:$0 sm:$0xff] (!%p596_p0) }
  0x62   : > { %616 = vmatprep.subr.bf16.mxu0 (!%p596_p0), %v893_v0 }
  0x65   : > { %617 = vmatpush3.bf16.msra.mxu0 (!%p596_p0), %v719_v2 }
  0x67   : > { %v405_v33 = vld [vmem:[#allocation2] sm:$0xff] }
  0x68   : > { %619 = vmatmul.mubr.msk.bf16.vlgmr.msra.gmra.mrb[0].mxu0 %vm251_vm0, %v720_v3 }
 0x13b   : > { %v321_v5 = vpop.f32.mrb[0].mxu0 }
 0x13c   : > { %v322_v6 = vadd.f32 %v597_v4, %v321_v5  ;;  %v620_v7 = vpop.f32.mrb[1].mxu0 }
 0x13d   : > { %v324_v8 = vpop.f32.mrb[2].mxu0 }
 0x13e   : > { %v325_v9 = vadd.f32 %v597_v4, %v324_v8  ;;  %364 = vrot.lane.b32.xlu1 %v322_v6, %s895_s23  ;;  %v621_v10 = vpop.f32.mrb[3].mxu0  ;;  %v328_v11 = vmul.f32 %v322_v6, %v322_v6 }
 0x140   : > { %344 = vrot.lane.b32.xlu0 %v328_v11, %s895_s23  ;;  %v330_v12 = vsel %vm251_vm0, %v328_v11, 0.0  ;;  %v329_v15 = vmul.f32 %v325_v9, %v325_v9 }
 0x142   : > { %v333_v16 = vsel %vm251_vm0, %v329_v15, 0.0 }
 0x162   : > { %331 = vadd.xlane.f32.xlu1 %v330_v12 }
 0x1b0   : > { %v365_v17 = vpop.permute.xlu1 %364 }
 0x1b2   : > { %v345_v13 = vpop.permute.xlu0 %344 }
 0x1b3   : > { %v350_v14 = vsel %vm251_vm0, %v345_v13, 0.0 }
 0x1b4   : > { %351 = vadd.xlane.f32.xlu0 %v350_v14 }
 0x1b8   : > { %334 = vadd.xlane.f32.xlu0 %v333_v16 }
 0x1ef   : > { %v332_v18 = vpop.xlane.xlu1 %331 }
 0x1f0   : > { %v336_v20 = vadd.f32 1e-12, %v332_v18 }
 0x241   : > { %v352_v19 = vpop.xlane.xlu0 %351 }
 0x242   : > { %v356_v21 = vadd.f32 1e-12, %v352_v19 }
 0x244   : > { %721 = vrsqrt.f32 %v356_v21 }
 0x245   : > { %v335_v22 = vpop.xlane.xlu0 %334  ;;  %723 = vrsqrt.f32 %v336_v20 }
 0x246   : > { %v337_v23 = vadd.f32 1e-12, %v335_v22 }
 0x248   : > { %725 = vrsqrt.f32 %v337_v23 }
 0x24e   : > { %v722_v24 = vpop.eup %721 }
 0x24f   : > { %v360_v25 = vmul.f32 %v722_v24, %v322_v6  ;;  %v724_v26 = vpop.eup %723 }
 0x250   : > { %v340_v29 = vmul.f32 %v724_v26, %v322_v6 }
 0x251   : > { %v370_v27 = vmul.f32 %v365_v17, %v360_v25 }
 0x252   : > { %v726_v28 = vpop.eup %725 }
 0x253   : > { %v341_v30 = vmul.f32 %v726_v28, %v325_v9  ;;  %v407_v31 = vsel %vm406_vm2, %v370_v27, 0.0 }
 0x254   : > { %411 = vrot.lane.b32.xlu0 %v407_v31, %s895_s23 }
 0x255   : > { %v417_v32 = vpack.c.bf16 %v341_v30, %v340_v29 }
 0x257   : > { %422 = vst.msk [vmem:[#allocation4] sm:$0xff] %vm251_vm0, %v417_v32 }
 0x2c6   : > { %v412_v34 = vpop.permute.xlu0 %411 }
 0x2c7   : > { %v414_v35 = vadd.f32 %v412_v34, %v405_v33 }
 0x2c9   : > { %415 = vst.msk [vmem:[#allocation2] sm:$0xff] %vm251_vm0, %v414_v35 }
 0x2d0   : > { %v426_v36 = vld [vmem:[#allocation2] sm:$0xff] }
 0x2d1   : > { %v427_v37 = vsel %vm251_vm0, %v426_v36, 0.0 }
 0x2d2   : > { %v428_v38 = vrot.slane %v427_v37, 4 }
 0x2d4   : > { %v429_v39 = vadd.f32 %v428_v38, %v427_v37 }
 0x2d6   : > { %v430_v40 = vrot.slane %v429_v39, 2 }
 0x2d8   : > { %v431_v41 = vadd.f32 %v430_v40, %v429_v39 }
 0x2da   : > { %v432_v42 = vrot.slane %v431_v41, 1 }
 0x2dc   : > { %v433_v43 = vadd.f32 %v432_v42, %v431_v41 }
 0x2de   : > { %435 = vst.msk [vmem:[#allocation3] sm:$0x1] %vm434_vm3, %v433_v43 }
 0x2df PF: > { %p602_p11 = scmp.ne.s32.totalorder %s871_s15, 1 }
 0x2e0   : > { %v445_v44 = vld [vmem:[#allocation4] sm:$0xff] (!%p602_p11)  ;;  %vm457_vm4 = vcmask (!%p602_p11), 261120  }
 0x2e1   : > { %439 = sbr.rel (%p602_p11) target bundleno = 745 (0x2e9), region = 64  ;;  %v446_v46 = vunpack.c.l.bf16 (!%p602_p11), %v445_v44  ;;  %v447_v47 = vunpack.c.h.bf16 (!%p602_p11), %v445_v44 }
 0x2e5   : > { %v603_v45 = vld [vmem:[#allocation3] ss:$0 sm:$0xff] (!%p602_p11) }
 0x2e6   : > { %v455_v48 = vmul.f32 (!%p602_p11), %v603_v45, %v446_v46  ;;  %v456_v49 = vmul.f32 (!%p602_p11), %v603_v45, %v447_v47 }
 0x2e8   : > { %458 = vst.msk [vmem:[%s1099_s20] sm:$0xff] %vm457_vm4, %v455_v48  ;;  %459 = vst.msk [vmem:[%s1099_s20 + $0x8] sm:$0xff] %vm457_vm4, %v456_v49 }
 0x2e9 PF: > { %s610_s27 = sshll.u32 %s875_s16, 8  ;;  %s477_s8 = sshll.u32 %s1099_s20, 4  ;;  %s1126_s8 = int_to_ptr.vmem [resolvable:$true] %s477_s8 }
 0x2ea   : > { %s1123_s10 = scalar_lea.hbm %s1183_s3, %s610_s27  ;;  %s461_s9 = scalar_lea.sflag [#allocation7], %s1086_s21 }
 0x2eb   : > { %s785_s28 = scalar_lea.vmem %s1126_s8, 256  ;;  %s896_s5 = smov [#allocation10]  }
 0x2ec   : > { %p786_p10 = scmp.ne.s32.totalorder %s1126_s8, %s785_s28  ;;  %s789_s6 = sshll.u32 %s896_s5, 4  ;;  %s790_s6 = int_to_ptr.vmem [resolvable:$false] %s789_s6 }
 0x2ed   : > { %s791_s16 = scalar_lea.vmem %s790_s6, 512  ;;  %p792_p3 = scmp.lt.s32.totalorder %s1126_s8, %s790_s6 }
 0x2ee   : > { %p787_p12 = pnand %p786_p10, %p1025_p8  ;;  %p793_p7 = scmp.lt.s32.totalorder %s791_s16, %s785_s28 }
 0x2f0   : > { %p788_p13 = pneg %p787_p12  ;;  %p794_p1 = por %p793_p7, %p792_p3 }
 0x2f2   : > { %p795_p2 = pnand %p794_p1, %p788_p13 }
 0x2f4   : > { %798 = shalt.err (!%p795_p2)
}
 0x2f5   : > { %s799_s26 = scalar_lea.hbm %s1123_s10, 256  ;;  %s803_s24 = scalar_lea.hbm %s1183_s3, 512 }
 0x2f6   : > { %p800_p4 = scmp.ne.s32.totalorder %s1123_s10, %s799_s26  ;;  %p804_p6 = scmp.lt.u32.totalorder %s1123_s10, %s1183_s3 }
 0x2f7   : > { %p805_p0 = scmp.lt.u32.totalorder %s803_s24, %s799_s26  ;;  %p807_p10 = scmp.lt.u32.totalorder %s799_s26, %s1123_s10 }
 0x2f8   : > { %p801_p5 = pnand %p800_p4, %p1025_p8 }
 0x2f9   : > { %p806_p11 = por %p805_p0, %p804_p6 }
 0x2fa   : > { %p802_p9 = pneg %p801_p5 }
 0x2fb   : > { %p808_p12 = por %p807_p10, %p806_p11 }
 0x2fd   : > { %p809_p13 = pnand %p808_p12, %p802_p9 }
 0x2ff   : > { %812 = shalt.err (!%p809_p13)
}
 0x300   : > { %s897_s7 = smov 128   ;;  %s898_s15 = smov 8  }
 0x301   : > { %628 = dma.vmem_to_hbm [thread:$0]  (%p1025_p8), %s1126_s8, 256, %s1123_s10, %s461_s9, %s897_s7, %s897_s7, %s898_s15  }
 0x302 PF: > { %p645_p3 = scmp.ge.s32.totalorder %s887_s19, 2  ;;  %s492_s28 = sand.u32 1, %s859_s12  }
 0x303   : > { %p1204_p7 = scmp.ne.s32.totalorder %s1193_s25, 0  ;;  %s493_s5 = scalar_lea.sflag [#allocation7], %s492_s28 }
 0x305   : > { %p639_p1 = pnand %p645_p3, %p1204_p7 }
 0x307   : > { %854 = dma.done.wait (!%p639_p1), %s493_s5, 256  }
 0x308   : > { %856 = vsyncadd (!%p639_p1), %s493_s5, 4294967040  ;;  %s20_s19 = sadd.s32 1, %s887_s19   ;;  %s1205_s12 = smov %s863_s13 }
 0x309   : > { %p17_p2 = scmp.ge.s32.totalorder %s20_s19, 6   ;;  %s1206_s13 = smov %s867_s14 }
 0x30a   : > { %s1207_s14 = smov %s1042_s11  ;;  %s1208_s15 = smov %s879_s17 }
 0x30b   : > { %s1209_s16 = smov %s883_s18  ;;  %s1210_s17 = smov %s1213_s30 }
 0x30c   : > { %s1211_s18 = smov %s1217_s4  ;;  %19 = sbr.rel (!%p17_p2) target bundleno = 8 (0x8), region = 107 }
 0x313   :  { %498 = vsyncpa [#allocation6], 1 }
 0x314   :  { %500 = vsyncpa [#allocation6 + $0x1], 1 }
 0x315   :  { %501 = vsyncpa [#allocation9], 1 }
 0x316   :  { %502 = vsyncpa [#allocation7], 1 }
 0x317   :  { %504 = vsyncpa [#allocation7 + $0x1], 1 }

</bundles_post_ra>
